<compile_context>
chip_gen: v7x
topology: tpu7x:2x2x1
jax: 0.10.0
libtpu: 0.0.40
codegen_flags: <defaults>
</compile_context>

<pallas_src>
import functools

import jax
import jax.numpy as jnp
from jax.experimental import pallas as pl
from jax.experimental.pallas import tpu as pltpu

_LANE = 128


def _round_up(n: int, m: int) -> int:
    return ((n + m - 1) // m) * m


def _has_bf16_vpu() -> bool:
    """True on v6e/v7x (bf16 VPU/EUP); False on v5e and older (keep tanh f32)."""
    try:
        kind = jax.devices()[0].device_kind.lower()
    except Exception:  # pragma: no cover - no devices
        return False
    return not any(t in kind for t in ("v2", "v3", "v4", "v5"))


def _qnet_kernel(num_hidden, act_dtype, dim_action, *refs):
    """refs = (x_ref, w1, b1, ..., wN, bN, w_out, b_out, out_ref).

    Weights are lane-padded (multiple-of-128 widths) and may be bf16; biases
    are f32.  All matmuls accumulate in f32 (preferred_element_type).
    """
    x_ref = refs[0]
    out_ref = refs[-1]
    p = refs[1:-1]

    x = x_ref[...]  # (tile, dim_obs) f32
    for i in range(num_hidden):
        w = p[2 * i][...]
        b = p[2 * i + 1][...]  # f32 bias, (1, n_pad)
        h = jnp.dot(x.astype(w.dtype), w, preferred_element_type=jnp.float32) + b
        x = jnp.tanh(h.astype(act_dtype))
    w_out = p[-2][...]
    b_out = p[-1][...]
    y = (
        jnp.dot(x.astype(w_out.dtype), w_out, preferred_element_type=jnp.float32)
        + b_out
    )
    # Store only the valid Q-value columns (narrow output block): ~32x less HBM
    # writeback than a lane-padded f32 slab, and no second slicing pass outside.
    out_ref[...] = y[:, :dim_action].astype(out_ref.dtype)


def qnetwork_forward(
    x,
    params,
    *,
    tile_m=2048,
    weight_dtype=jnp.bfloat16,
    activation_dtype=None,
):
    """Forward pass of the Q-network.

    x:      (batch, dim_obs) float32.
    params: list of (W, b) with W (dim_in, dim_out) == torch W.T, b (1, dim_out).
            The last pair is the (un-activated) output layer.
    tile_m: batch tile size (rounded to a multiple of 8). Weights stay resident.
    weight_dtype: jnp.bfloat16 (default, native MXU path) or jnp.float32.
    activation_dtype: dtype used for tanh; None -> bf16 on v6e/v7x (if weights
            are bf16), f32 otherwise.
    """
    batch, dim_obs = x.shape
    num_hidden = len(params) - 1
    dim_action = params[-1][0].shape[1]

    if activation_dtype is None:
        if weight_dtype == jnp.bfloat16 and _has_bf16_vpu():
            activation_dtype = jnp.bfloat16
        else:
            activation_dtype = jnp.float32

    # ---- pad parameters to lane-dense (multiple-of-128) widths --------------
    padded_params = []
    prev_in = dim_obs  # K of the first layer stays at the true obs width
    for w, b in params:
        k_in, n_out = w.shape
        n_pad = _round_up(n_out, _LANE)
        w_p = jnp.zeros((prev_in, n_pad), dtype=weight_dtype)
        w_p = w_p.at[:k_in, :n_out].set(w.astype(weight_dtype))
        b_p = jnp.zeros((1, n_pad), dtype=jnp.float32)
        b_p = b_p.at[:, :n_out].set(b.astype(jnp.float32))
        padded_params.append((w_p, b_p))
        prev_in = n_pad

    # ---- batch tiling --------------------------------------------------------
    batch8 = _round_up(batch, 8)
    tile = min(_round_up(max(int(tile_m), 8), 8), batch8)
    # v7x megacore: for medium/large batches make sure the 'parallel' batch axis
    # has >= 2 grid steps so both TensorCores get work.
    if batch8 >= 1024 and tile >= batch8:
        tile = min(batch8, _round_up((batch8 + 1) // 2, 256))
    batch_pad = _round_up(batch, tile)
    if batch_pad != batch:
        x = jnp.pad(x, ((0, batch_pad - batch), (0, 0)))
    grid = (batch_pad // tile,)

    # ---- BlockSpecs (explicit, no late-binding closures) ---------------------
    x_spec = pl.BlockSpec((tile, dim_obs), lambda i: (i, 0))
    param_specs = []
    flat_params = []
    for w_p, b_p in padded_params:
        # Constant index_map -> block fetched once, VMEM-resident across tiles.
        param_specs.append(pl.BlockSpec(w_p.shape, lambda i: (0, 0)))
        param_specs.append(pl.BlockSpec(b_p.shape, lambda i: (0, 0)))
        flat_params.append(w_p)
        flat_params.append(b_p)
    # Narrow output block: last dim == full array dim, so (8,128) rule is met.
    out_spec = pl.BlockSpec((tile, dim_action), lambda i: (i, 0))

    # ---- cost estimate (helps XLA schedule surrounding pad/slice ops) --------
    flops = 0
    transcendentals = 0
    param_bytes = 0
    for li, (w_p, b_p) in enumerate(padded_params):
        flops += 2 * batch_pad * w_p.shape[0] * w_p.shape[1]
        param_bytes += w_p.size * w_p.dtype.itemsize + b_p.size * 4
        if li < num_hidden:
            transcendentals += batch_pad * w_p.shape[1]
    bytes_accessed = (
        batch_pad * dim_obs * 4 + param_bytes + batch_pad * dim_action * 4
    )
    cost = pl.CostEstimate(
        flops=int(flops),
        transcendentals=int(transcendentals),
        bytes_accessed=int(bytes_accessed),
    )

    kernel = functools.partial(_qnet_kernel, num_hidden, activation_dtype, dim_action)

    out = pl.pallas_call(
        kernel,
        out_shape=jax.ShapeDtypeStruct((batch_pad, dim_action), jnp.float32),
        grid_spec=pltpu.PrefetchScalarGridSpec(
            num_scalar_prefetch=0,
            grid=grid,
            in_specs=[x_spec] + param_specs,
            out_specs=out_spec,
        ),
        compiler_params=pltpu.CompilerParams(
            dimension_semantics=("parallel",),      # megacore sharding on v7x
            vmem_limit_bytes=48 * 1024 * 1024,      # scoped default (16/32 MiB) is the cap, not physical VMEM
        ),
        cost_estimate=cost,
    )(x, *flat_params)

    # Only batch padding (if any) remains to slice away; the slab is tiny.
    return out if batch_pad == batch else out[:batch]


def init_qnetwork_params(key, dim_obs, dim_action, dims_hidden_neurons=(64, 64)):
    """Xavier-uniform weights, zero biases (matches the torch init scheme).

    W is stored as (dim_in, dim_out) == torch W.T, b as (1, dim_out).
    """
    n_neurons = (dim_obs,) + tuple(dims_hidden_neurons) + (dim_action,)
    params = []
    for dim_in, dim_out in zip(n_neurons[:-1], n_neurons[1:]):
        key, sub = jax.random.split(key)
        bound = jnp.sqrt(6.0 / (dim_in + dim_out))
        w = jax.random.uniform(
            sub, (dim_in, dim_out), dtype=jnp.float32, minval=-bound, maxval=bound
        )
        b = jnp.zeros((1, dim_out), dtype=jnp.float32)
        params.append((w, b))
    return params


def qnetwork_reference(x, params):
    """Pure-JAX f32 reference for correctness checks."""
    num_hidden = len(params) - 1
    for i in range(num_hidden):
        w, b = params[i]
        x = jnp.tanh(x @ w + b)
    w, b = params[-1]
    return x @ w + b


if __name__ == "__main__":
    key = jax.random.PRNGKey(0)

    dim_obs = 8
    dim_action = 4
    dims_hidden = (64, 64)

    k_params, k_x1, k_x2, k_x3 = jax.random.split(key, 4)
    params = init_qnetwork_params(k_params, dim_obs, dim_action, dims_hidden)

    # 1) f32 path, tiny batch: tight-tolerance check vs the pure-JAX reference.
    batch = 2
    x = jax.random.normal(k_x1, (batch, dim_obs), dtype=jnp.float32)
    out = jax.block_until_ready(
        qnetwork_forward(
            x, params, weight_dtype=jnp.float32, activation_dtype=jnp.float32
        )
    )
    ref = qnetwork_reference(x, params)
    assert out.shape == (batch, dim_action), out.shape
    assert jnp.allclose(out, ref, atol=1e-5, rtol=1e-5), (out, ref)

    # 2) Default (bf16-matmul) path with a small tile: multiple grid steps and
    #    batch padding.  bf16 operands need a looser tolerance.
    batch2 = 260
    x2 = jax.random.normal(k_x2, (batch2, dim_obs), dtype=jnp.float32)
    out2 = jax.block_until_ready(qnetwork_forward(x2, params, tile_m=128))
    ref2 = qnetwork_reference(x2, params)
    assert out2.shape == (batch2, dim_action), out2.shape
    assert jnp.allclose(out2, ref2, atol=5e-2, rtol=5e-2)

    # 3) Default big-tile path; exercises the ">= 2 grid steps" megacore split.
    batch3 = 2048
    x3 = jax.random.normal(k_x3, (batch3, dim_obs), dtype=jnp.float32)
    out3 = jax.block_until_ready(qnetwork_forward(x3, params))
    ref3 = qnetwork_reference(x3, params)
    assert out3.shape == (batch3, dim_action), out3.shape
    assert jnp.allclose(out3, ref3, atol=5e-2, rtol=5e-2)

    print("KERNEL_OK")
</pallas_src>

<mosaic_0001>
module attributes {stable_mosaic.version = 11 : i64} {
  func.func @_qnet_kernel(%arg0: i32, %arg1: memref<8x8xf32, #tpu.memory_space<vmem>>, %arg2: memref<8x128xf32, #tpu.memory_space<vmem>>, %arg3: memref<1x128xf32, #tpu.memory_space<vmem>>, %arg4: memref<128x128xf32, #tpu.memory_space<vmem>>, %arg5: memref<1x128xf32, #tpu.memory_space<vmem>>, %arg6: memref<128x128xf32, #tpu.memory_space<vmem>>, %arg7: memref<1x128xf32, #tpu.memory_space<vmem>>, %arg8: memref<8x4xf32, #tpu.memory_space<vmem>>) attributes {dimension_semantics = [#tpu.dimension_semantics<parallel>], iteration_bounds = array<i64: 1>, scalar_prefetch = 0 : i64, scratch_operands = 0 : i64, tpu.core_type = #tpu.core_type<tc>, window_params = [{transform_indices = @transform_0, window_bounds = array<i64: 8, 8>}, {pipeline_mode = #tpu.pipeline_mode<synchronous>, transform_indices = @transform_1, window_bounds = array<i64: 8, 128>}, {pipeline_mode = #tpu.pipeline_mode<synchronous>, transform_indices = @transform_2, window_bounds = array<i64: 1, 128>}, {pipeline_mode = #tpu.pipeline_mode<synchronous>, transform_indices = @transform_3, window_bounds = array<i64: 128, 128>}, {pipeline_mode = #tpu.pipeline_mode<synchronous>, transform_indices = @transform_4, window_bounds = array<i64: 1, 128>}, {pipeline_mode = #tpu.pipeline_mode<synchronous>, transform_indices = @transform_5, window_bounds = array<i64: 128, 128>}, {pipeline_mode = #tpu.pipeline_mode<synchronous>, transform_indices = @transform_6, window_bounds = array<i64: 1, 128>}, {transform_indices = @transform_7, window_bounds = array<i64: 8, 4>}]} {
    %c0 = arith.constant 0 : index
    %c0_0 = arith.constant 0 : index
    %0 = vector.load %arg1[%c0, %c0_0] : memref<8x8xf32, #tpu.memory_space<vmem>>, vector<8x8xf32>
    %c0_1 = arith.constant 0 : index
    %c0_2 = arith.constant 0 : index
    %1 = vector.load %arg2[%c0_1, %c0_2] : memref<8x128xf32, #tpu.memory_space<vmem>>, vector<8x128xf32>
    %c0_3 = arith.constant 0 : index
    %c0_4 = arith.constant 0 : index
    %2 = vector.load %arg3[%c0_3, %c0_4] : memref<1x128xf32, #tpu.memory_space<vmem>>, vector<1x128xf32>
    %cst = arith.constant dense<0.000000e+00> : vector<8x128xf32>
    %3 = tpu.matmul %0, %1, %cst {dimension_numbers = #tpu.dot_dimension_numbers<[1], [0], [0], [1], [0, 0, 1, 1], [], []>} : vector<8x8xf32>, vector<8x128xf32>, vector<8x128xf32> -> vector<8x128xf32>
    %4 = vector.broadcast %2 : vector<1x128xf32> to vector<8x128xf32>
    %5 = arith.addf %3, %4 : vector<8x128xf32>
    %6 = math.tanh %5 : vector<8x128xf32>
    %c0_5 = arith.constant 0 : index
    %c0_6 = arith.constant 0 : index
    %7 = vector.load %arg4[%c0_5, %c0_6] : memref<128x128xf32, #tpu.memory_space<vmem>>, vector<128x128xf32>
    %c0_7 = arith.constant 0 : index
    %c0_8 = arith.constant 0 : index
    %8 = vector.load %arg5[%c0_7, %c0_8] : memref<1x128xf32, #tpu.memory_space<vmem>>, vector<1x128xf32>
    %cst_9 = arith.constant dense<0.000000e+00> : vector<8x128xf32>
    %9 = tpu.matmul %6, %7, %cst_9 {dimension_numbers = #tpu.dot_dimension_numbers<[1], [0], [0], [1], [0, 0, 1, 1], [], []>} : vector<8x128xf32>, vector<128x128xf32>, vector<8x128xf32> -> vector<8x128xf32>
    %10 = vector.broadcast %8 : vector<1x128xf32> to vector<8x128xf32>
    %11 = arith.addf %9, %10 : vector<8x128xf32>
    %12 = math.tanh %11 : vector<8x128xf32>
    %c0_10 = arith.constant 0 : index
    %c0_11 = arith.constant 0 : index
    %13 = vector.load %arg6[%c0_10, %c0_11] : memref<128x128xf32, #tpu.memory_space<vmem>>, vector<128x128xf32>
    %c0_12 = arith.constant 0 : index
    %c0_13 = arith.constant 0 : index
    %14 = vector.load %arg7[%c0_12, %c0_13] : memref<1x128xf32, #tpu.memory_space<vmem>>, vector<1x128xf32>
    %cst_14 = arith.constant dense<0.000000e+00> : vector<8x128xf32>
    %15 = tpu.matmul %12, %13, %cst_14 {dimension_numbers = #tpu.dot_dimension_numbers<[1], [0], [0], [1], [0, 0, 1, 1], [], []>} : vector<8x128xf32>, vector<128x128xf32>, vector<8x128xf32> -> vector<8x128xf32>
    %16 = vector.broadcast %14 : vector<1x128xf32> to vector<8x128xf32>
    %17 = arith.addf %15, %16 : vector<8x128xf32>
    %18 = vector.extract_strided_slice %17 {offsets = [0, 0], sizes = [8, 4], strides = [1, 1]} : vector<8x128xf32> to vector<8x4xf32>
    %c0_15 = arith.constant 0 : index
    %c0_16 = arith.constant 0 : index
    %19 = vector.load %arg8[%c0_15, %c0_16] : memref<8x4xf32, #tpu.memory_space<vmem>>, vector<8x4xf32>
    tpu.vector_store %arg8[%c0_15, %c0_16], %18 {strides = array<i32>} : memref<8x4xf32, #tpu.memory_space<vmem>>, vector<8x4xf32>,
    return
  }
  func.func @transform_0(%arg0: i32) -> (i32, i32) {
    %c0_i32 = arith.constant 0 : i32
    %c0_i32_0 = arith.constant 0 : i32
    return %arg0, %c0_i32 : i32, i32
  }
  func.func @transform_1(%arg0: i32) -> (i32, i32) {
    %c0_i32 = arith.constant 0 : i32
    %c0_i32_0 = arith.constant 0 : i32
    %c0_i32_1 = arith.constant 0 : i32
    return %c0_i32, %c0_i32_0 : i32, i32
  }
  func.func @transform_2(%arg0: i32) -> (i32, i32) {
    %c0_i32 = arith.constant 0 : i32
    %c0_i32_0 = arith.constant 0 : i32
    %c0_i32_1 = arith.constant 0 : i32
    return %c0_i32, %c0_i32_0 : i32, i32
  }
  func.func @transform_3(%arg0: i32) -> (i32, i32) {
    %c0_i32 = arith.constant 0 : i32
    %c0_i32_0 = arith.constant 0 : i32
    %c0_i32_1 = arith.constant 0 : i32
    return %c0_i32, %c0_i32_0 : i32, i32
  }
  func.func @transform_4(%arg0: i32) -> (i32, i32) {
    %c0_i32 = arith.constant 0 : i32
    %c0_i32_0 = arith.constant 0 : i32
    %c0_i32_1 = arith.constant 0 : i32
    return %c0_i32, %c0_i32_0 : i32, i32
  }
  func.func @transform_5(%arg0: i32) -> (i32, i32) {
    %c0_i32 = arith.constant 0 : i32
    %c0_i32_0 = arith.constant 0 : i32
    %c0_i32_1 = arith.constant 0 : i32
    return %c0_i32, %c0_i32_0 : i32, i32
  }
  func.func @transform_6(%arg0: i32) -> (i32, i32) {
    %c0_i32 = arith.constant 0 : i32
    %c0_i32_0 = arith.constant 0 : i32
    %c0_i32_1 = arith.constant 0 : i32
    return %c0_i32, %c0_i32_0 : i32, i32
  }
  func.func @transform_7(%arg0: i32) -> (i32, i32) {
    %c0_i32 = arith.constant 0 : i32
    %c0_i32_0 = arith.constant 0 : i32
    return %arg0, %c0_i32 : i32, i32
  }
}

</mosaic_0001>

<bundles_post_ra>
// kernel: tpu_custom_call.1
= control target key start
LH: loop header
LB: loop body
LE: loop exit
PB: predicated region body
PF: predicated region fallthrough
CT: control target
= control target key end

     0   :  { %12 = vsyncpa [#allocation3], 0  ;;  %s755_s0 = inlined_call_operand.hbm [shape: f32[8,8], index: 0, kind: input, shape index: {}]   ;;  %s756_s1 = inlined_call_operand.hbm [shape: f32[8,128], index: 1, kind: input, shape index: {}]   ;;  %s757_s2 = inlined_call_operand.vmem [shape: f32[1,128], index: 2, kind: input, shape index: {}]   ;;  %s758_s3 = inlined_call_operand.hbm [shape: f32[128,128], index: 3, kind: input, shape index: {}]   ;;  %s759_s4 = inlined_call_operand.vmem [shape: f32[1,128], index: 4, kind: input, shape index: {}]   ;;  %s760_s5 = inlined_call_operand.hbm [shape: f32[128,128], index: 5, kind: input, shape index: {}]   ;;  %s761_s6 = inlined_call_operand.vmem [shape: f32[1,128], index: 6, kind: input, shape index: {}]   ;;  %s762_s7 = inlined_call_operand.vmem [shape: f32[8,4], index: 7, kind: output, shape index: {}]  }
   0x1   :  { %13 = vsyncpa [#allocation5], 0 }
   0x2   :  { %14 = vsyncpa [#allocation8], 0  ;;  %s627_s24 = smov [#allocation4]   ;;  %s628_s26 = smov [#allocation2]  }
   0x3   :  { %s31_s25 = sshll.u32 %s627_s24, 4  ;;  %s21_s27 = sshll.u32 %s628_s26, 4  ;;  %s32_s25 = int_to_ptr.vmem [resolvable:$true] %s31_s25  ;;  %s22_s27 = int_to_ptr.vmem [resolvable:$true] %s21_s27 }
   0x4   :  { %s533_s30 = scalar_lea.hbm %s756_s1, 128 }
   0x5   :  { %p534_p0 = scmp.ne.s32.totalorder %s756_s1, %s533_s30  ;;  %p537_p1 = scmp.lt.u32.totalorder %s533_s30, %s756_s1 }
   0x7   :  { %p539_p2 = pnand %p537_p1, %p534_p0 }
   0x9   :  { %542 = shalt.err (!%p539_p2)
}
   0xa   :  { %s543_s12 = scalar_lea.vmem %s32_s25, 128  ;;  %p548_p4 = scmp.lt.s32.totalorder %s32_s25, %s32_s25 }
   0xb   :  { %p544_p3 = scmp.ne.s32.totalorder %s32_s25, %s543_s12  ;;  %p549_p5 = scmp.lt.s32.totalorder %s543_s12, %s543_s12 }
   0xd   :  { %p550_p6 = por %p549_p5, %p548_p4 }
   0xf   :  { %p551_p7 = pnand %p550_p6, %p544_p3 }
  0x11   :  { %554 = shalt.err (!%p551_p7)
}
  0x12   :  { %34 = dma.hbm_to_vmem [thread:$0]  %s756_s1, 128, %s32_s25, [#allocation5]  }
  0x13   :  { %s555_s17 = scalar_lea.hbm %s755_s0, 128 }
  0x14   :  { %p556_p8 = scmp.ne.s32.totalorder %s755_s0, %s555_s17  ;;  %p559_p9 = scmp.lt.u32.totalorder %s555_s17, %s755_s0 }
  0x16   :  { %p561_p10 = pnand %p559_p9, %p556_p8 }
  0x18   :  { %564 = shalt.err (!%p561_p10)
}
  0x19   :  { %s565_s22 = scalar_lea.vmem %s22_s27, 128  ;;  %p570_p12 = scmp.lt.s32.totalorder %s22_s27, %s22_s27 }
  0x1a   :  { %p566_p11 = scmp.ne.s32.totalorder %s22_s27, %s565_s22  ;;  %p571_p13 = scmp.lt.s32.totalorder %s565_s22, %s565_s22 }
  0x1c   :  { %p572_p0 = por %p571_p13, %p570_p12 }
  0x1e   :  { %p573_p1 = pnand %p572_p0, %p566_p11 }
  0x20   :  { %576 = shalt.err (!%p573_p1)
}
  0x21   :  { %24 = dma.hbm_to_vmem [thread:$0]  %s755_s0, 128, %s22_s27, [#allocation3]  }
  0x22   :  { %s629_s24 = smov [#allocation6]   ;;  %s577_s29 = scalar_lea.hbm %s758_s3, 2048 }
  0x23   :  { %s42_s25 = sshll.u32 %s629_s24, 4  ;;  %p578_p2 = scmp.ne.s32.totalorder %s758_s3, %s577_s29  ;;  %s43_s25 = int_to_ptr.vmem [resolvable:$true] %s42_s25 }
  0x24   :  { %p581_p3 = scmp.lt.u32.totalorder %s577_s29, %s758_s3 }
  0x26   :  { %p583_p4 = pnand %p581_p3, %p578_p2 }
  0x28   :  { %586 = shalt.err (!%p583_p4)
}
  0x29   :  { %s587_s11 = scalar_lea.vmem %s43_s25, 2048  ;;  %p592_p6 = scmp.lt.s32.totalorder %s43_s25, %s43_s25 }
  0x2a   :  { %p588_p5 = scmp.ne.s32.totalorder %s43_s25, %s587_s11  ;;  %p593_p7 = scmp.lt.s32.totalorder %s587_s11, %s587_s11 }
  0x2c   :  { %p594_p8 = por %p593_p7, %p592_p6 }
  0x2e   :  { %p595_p9 = pnand %p594_p8, %p588_p5 }
  0x30   :  { %598 = shalt.err (!%p595_p9)
}
  0x31   :  { %s630_s0 = smov 128   ;;  %s631_s27 = smov 8  }
  0x32   :  { %48 = dma.hbm_to_vmem [thread:$0]  %s758_s3, 2048, %s43_s25, [#allocation5], %s630_s0, %s630_s0, %s631_s27  }
  0x33   :  { %s632_s14 = smov [#allocation7]   ;;  %s599_s18 = scalar_lea.hbm %s760_s5, 2048 }
  0x34   :  { %s56_s15 = sshll.u32 %s632_s14, 4  ;;  %p600_p10 = scmp.ne.s32.totalorder %s760_s5, %s599_s18  ;;  %s57_s15 = int_to_ptr.vmem [resolvable:$true] %s56_s15 }
  0x35   :  { %p603_p11 = scmp.lt.u32.totalorder %s599_s18, %s760_s5 }
  0x37   :  { %p605_p12 = pnand %p603_p11, %p600_p10 }
  0x39   :  { %608 = shalt.err (!%p605_p12)
}
  0x3a   :  { %s609_s1 = scalar_lea.vmem %s57_s15, 2048  ;;  %p614_p0 = scmp.lt.s32.totalorder %s57_s15, %s57_s15 }
  0x3b   :  { %p610_p13 = scmp.ne.s32.totalorder %s57_s15, %s609_s1  ;;  %p615_p1 = scmp.lt.s32.totalorder %s609_s1, %s609_s1 }
  0x3d   :  { %p616_p2 = por %p615_p1, %p614_p0 }
  0x3f   :  { %p617_p3 = pnand %p616_p2, %p610_p13 }
  0x41   :  { %620 = shalt.err (!%p617_p3)
}
  0x42   :  { %62 = dma.hbm_to_vmem [thread:$0]  %s760_s5, 2048, %s57_s15, [#allocation8], %s630_s0, %s630_s0, %s631_s27  }
  0x43   :  { %621 = dma.done.wait [#allocation3], 128  }
  0x44   :  { %622 = vsyncadd [#allocation3], 4294967168 }
  0x45   :  { %623 = dma.done.wait [#allocation5], 2176  }
  0x46   :  { %624 = vsyncadd [#allocation5], 4294965120 }
  0x47   :  { %625 = dma.done.wait [#allocation8], 2048  }
  0x48   :  { %626 = vsyncadd [#allocation8], 4294965248  ;;  %v633_v0 = vmov 0.0   ;;  %vm634_vm0 = vmmov 0   ;;  %v635_v1 = vmov 0.0|0.0   ;;  %vm86_vm1 = vcmask 64512  }
  0x49   :  { %397 = vmatprep.subr.mxu0 %v633_v0  ;;  %399 = vmatprep.mubr.msk.f32.mxu0 %vm634_vm0, %v633_v0  ;;  %v78_v2 = vld [vmem:[#allocation4] sm:$0xff]  ;;  %v77_v3 = vld [vmem:[#allocation2] sm:$0xff]  ;;  %v161_v4 = vld [vmem:[#allocation6] sm:$0xff]  ;;  %vm348_vm2 = vcmask 31744  }
  0x4a   :  { %472 = vmatprep.subr.bf16.mxu1 %v635_v1  ;;  %434 = vmatprep.mubr.msk.f32.mxu1 %vm634_vm0, %v633_v0  ;;  %v162_v5 = vld [vmem:[#allocation6 + $0x8] sm:$0xff]  ;;  %v163_v6 = vld [vmem:[#allocation6 + $0x10] sm:$0xff]  ;;  %v164_v7 = vld [vmem:[#allocation6 + $0x18] sm:$0xff] }
  0x4b   :  { %398 = vmatpush3.msra.mxu0 %v78_v2  ;;  %v473_v8 = vpack.c.bf16 %v162_v5, %v161_v4  ;;  %v476_v9 = vpack.c.bf16 %v164_v7, %v163_v6  ;;  %v165_v10 = vld [vmem:[#allocation6 + $0x20] sm:$0xff]  ;;  %v166_v11 = vld [vmem:[#allocation6 + $0x28] sm:$0xff]  ;;  %v167_v13 = vld [vmem:[#allocation6 + $0x30] sm:$0xff] }
  0x4c   :  { %400 = vmatmul.mubr.msk.f32.vlgmr.msra.gmra.mrb[0].mxu0 %vm86_vm1, %v77_v3  ;;  %496 = vmatprep.subr.bf16.mxu0 %v635_v1  ;;  %v479_v12 = vpack.c.bf16 %v166_v11, %v165_v10  ;;  %v168_v14 = vld [vmem:[#allocation6 + $0x38] sm:$0xff]  ;;  %v169_v16 = vld [vmem:[#allocation6 + $0x40] sm:$0xff]  ;;  %v170_v17 = vld [vmem:[#allocation6 + $0x48] sm:$0xff] }
  0x4d   :  { %469 = vmatprep.mubr.msk.f32.mxu0 %vm634_vm0, %v633_v0  ;;  %474 = vmatpush3.bf16.msra.mxu1 %v473_v8  ;;  %v482_v15 = vpack.c.bf16 %v168_v14, %v167_v13  ;;  %v485_v18 = vpack.c.bf16 %v170_v17, %v169_v16  ;;  %v171_v19 = vld [vmem:[#allocation6 + $0x50] sm:$0xff]  ;;  %v172_v20 = vld [vmem:[#allocation6 + $0x58] sm:$0xff]  ;;  %v173_v22 = vld [vmem:[#allocation6 + $0x60] sm:$0xff] }
  0x4e   :  { %475 = vmatprep.subr.bf16.mxu1 %v635_v1  ;;  %v488_v21 = vpack.c.bf16 %v172_v20, %v171_v19  ;;  %v174_v23 = vld [vmem:[#allocation6 + $0x68] sm:$0xff]  ;;  %v175_v25 = vld [vmem:[#allocation6 + $0x70] sm:$0xff]  ;;  %v176_v26 = vld [vmem:[#allocation6 + $0x78] sm:$0xff] }
  0x4f   :  { %v491_v24 = vpack.c.bf16 %v174_v23, %v173_v22  ;;  %v494_v27 = vpack.c.bf16 %v176_v26, %v175_v25  ;;  %v255_v28 = vld [vmem:[#allocation7] sm:$0xff]  ;;  %v256_v29 = vld [vmem:[#allocation7 + $0x8] sm:$0xff]  ;;  %v257_v30 = vld [vmem:[#allocation7 + $0x10] sm:$0xff] }
  0x50   :  { %v497_v31 = vpack.c.bf16 %v256_v29, %v255_v28  ;;  %v258_v32 = vld [vmem:[#allocation7 + $0x18] sm:$0xff]  ;;  %v259_v34 = vld [vmem:[#allocation7 + $0x20] sm:$0xff]  ;;  %v260_v35 = vld [vmem:[#allocation7 + $0x28] sm:$0xff] }
  0x51   :  { %477 = vmatpush3.bf16.msra.mxu1 %v476_v9  ;;  %v500_v33 = vpack.c.bf16 %v258_v32, %v257_v30  ;;  %v503_v36 = vpack.c.bf16 %v260_v35, %v259_v34  ;;  %v261_v37 = vld [vmem:[#allocation7 + $0x30] sm:$0xff]  ;;  %v262_v38 = vld [vmem:[#allocation7 + $0x38] sm:$0xff]  ;;  %v263_v40 = vld [vmem:[#allocation7 + $0x40] sm:$0xff] }
  0x52   :  { %478 = vmatprep.subr.bf16.mxu1 %v635_v1  ;;  %498 = vmatpush3.bf16.msra.mxu0 %v497_v31  ;;  %v506_v39 = vpack.c.bf16 %v262_v38, %v261_v37  ;;  %v264_v41 = vld [vmem:[#allocation7 + $0x48] sm:$0xff]  ;;  %v357_v43 = vld [vmem:[%s757_s2] ss:$0 sm:$0xff]  ;;  %v266_v49 = vld [vmem:[#allocation7 + $0x58] sm:$0xff] }
  0x53   :  { %499 = vmatprep.subr.bf16.mxu0 %v635_v1  ;;  %v509_v42 = vpack.c.bf16 %v264_v41, %v263_v40  ;;  %v265_v48 = vld [vmem:[#allocation7 + $0x50] sm:$0xff]  ;;  %v267_v51 = vld [vmem:[#allocation7 + $0x60] sm:$0xff]  ;;  %v268_v52 = vld [vmem:[#allocation7 + $0x68] sm:$0xff] }
  0x54   :  { %v512_v50 = vpack.c.bf16 %v266_v49, %v265_v48  ;;  %v515_v53 = vpack.c.bf16 %v268_v52, %v267_v51  ;;  %v269_v54 = vld [vmem:[#allocation7 + $0x70] sm:$0xff]  ;;  %v270_v55 = vld [vmem:[#allocation7 + $0x78] sm:$0xff] }
  0x55   :  { %480 = vmatpush3.bf16.msra.mxu1 %v479_v12  ;;  %v518_v56 = vpack.c.bf16 %v270_v55, %v269_v54  ;;  %v359_v57 = vld [vmem:[%s759_s4] ss:$0 sm:$0xff] }
  0x56   :  { %481 = vmatprep.subr.bf16.mxu1 %v635_v1  ;;  %501 = vmatpush3.bf16.msra.mxu0 %v500_v33  ;;  %v360_v62 = vld [vmem:[%s761_s6] ss:$0 sm:$0xff] }
  0x57   :  { %502 = vmatprep.subr.bf16.mxu0 %v635_v1 }
  0x59   :  { %483 = vmatpush3.bf16.msra.mxu1 %v482_v15 }
  0x5a   :  { %484 = vmatprep.subr.bf16.mxu1 %v635_v1  ;;  %504 = vmatpush3.bf16.msra.mxu0 %v503_v36 }
  0x5b   :  { %505 = vmatprep.subr.bf16.mxu0 %v635_v1 }
  0x5d   :  { %486 = vmatpush3.bf16.msra.mxu1 %v485_v18 }
  0x5e   :  { %487 = vmatprep.subr.bf16.mxu1 %v635_v1  ;;  %507 = vmatpush3.bf16.msra.mxu0 %v506_v39 }
  0x5f   :  { %508 = vmatprep.subr.bf16.mxu0 %v635_v1 }
  0x61   :  { %489 = vmatpush3.bf16.msra.mxu1 %v488_v21 }
  0x62   :  { %490 = vmatprep.subr.bf16.mxu1 %v635_v1  ;;  %510 = vmatpush3.bf16.msra.mxu0 %v509_v42 }
  0x63   :  { %511 = vmatprep.subr.bf16.mxu0 %v635_v1 }
  0x65   :  { %492 = vmatpush3.bf16.msra.mxu1 %v491_v24 }
  0x66   :  { %493 = vmatprep.subr.bf16.mxu1 %v635_v1  ;;  %513 = vmatpush3.bf16.msra.mxu0 %v512_v50 }
  0x67   :  { %514 = vmatprep.subr.bf16.mxu0 %v635_v1 }
  0x69   :  { %495 = vmatpush3.bf16.msra.mxu1 %v494_v27 }
  0x6a   :  { %516 = vmatpush3.bf16.msra.mxu0 %v515_v53 }
  0x6b   :  { %517 = vmatprep.subr.bf16.mxu0 %v635_v1 }
  0x6e   :  { %519 = vmatpush3.bf16.msra.mxu0 %v518_v56 }
 0x11f   :  { %v156_v44 = vpop.f32.mrb[0].mxu0 }
 0x120   :  { %v157_v45 = vadd.f32 %v357_v43, %v156_v44  ;;  %v401_v46 = vpop.f32.mrb[1].mxu0 }
 0x122   :  { %529 = vtanh.f32 %v157_v45 }
 0x12c   :  { %v530_v47 = vpop.eup %529 }
 0x12d   :  { %435 = vmatmul.mubr.f32.vlgmr.msra.gmra.mrb[0].mxu1 %v530_v47 }
 0x200   :  { %v250_v58 = vpop.f32.mrb[0].mxu1 }
 0x201   :  { %v251_v59 = vadd.f32 %v359_v57, %v250_v58  ;;  %v436_v60 = vpop.f32.mrb[1].mxu1 }
 0x203   :  { %531 = vtanh.f32 %v251_v59 }
 0x20d   :  { %v532_v61 = vpop.eup %531 }
 0x20e   :  { %470 = vmatmul.mubr.f32.vlgmr.msra.gmra.mrb[2].mxu0 %v532_v61 }
 0x2e1   :  { %v344_v63 = vpop.f32.mrb[2].mxu0 }
 0x2e2   :  { %v345_v0 = vadd.f32 %v360_v62, %v344_v63  ;;  %v471_v2 = vpop.f32.mrb[3].mxu0 }
 0x2e4   :  { %349 = vst.msk [vmem:[%s762_s7] sm:$0xff] %vm348_vm2, %v345_v0 }
 0x2e5   :  { %354 = vsyncpa [#allocation3], 1 }
 0x2e6   :  { %355 = vsyncpa [#allocation5], 1 }
 0x2e7   :  { %356 = vsyncpa [#allocation8], 1 }

</bundles_post_ra>
